<compile_context>
chip_gen: v7x
topology: tpu7x:2x2x1
jax: 0.10.0
libtpu: 0.0.40
codegen_flags: <defaults>
</compile_context>

<pallas_src>
import functools

import jax
import jax.numpy as jnp
from jax.experimental import pallas as pl
from jax.experimental.pallas import tpu as pltpu

_EPS = 1e-5
_VMEM_LIMIT = 32 * 1024 * 1024  # safe on v5e/v6e (128 MiB) and v7x (64 MiB physical)


# ------------------------------ mish --------------------------------------- #
def _mish(x, approx):
    # Mish(x) = x * tanh(softplus(x));  tanh(softplus(x)) = t(t+2) / (t(t+2)+2)
    # with t = exp(min(x, 20)).  For x > 20 (clamped), num + 2 == num exactly in
    # fp32, so the ratio is 1 and no extra where/select is needed — PyTorch's
    # softplus threshold-20 passthrough is preserved without a compare+select.
    t = jnp.exp(jnp.minimum(x, 20.0))
    num = t * (t + 2.0)
    den = num + 2.0
    if approx:
        # EUP vrcp slot — keeps the long Newton-divide off the VALU path.
        return x * (num * pl.reciprocal(den, approx=True))
    return x * (num / den)


def _mish_exact(x):
    # Reference Mish (matches PyTorch: softplus with threshold=20, then tanh).
    sp = jnp.where(x > 20.0, x, jnp.log1p(jnp.exp(jnp.minimum(x, 20.0))))
    return x * jnp.tanh(sp)


# ------------------------------ kernels ------------------------------------ #
def _stats1_kernel(p_ref, w1_ref, s_ref, ss_ref):
    # p_ref : (9*C1, Mt) im2col patch tile     w1_ref : (SC1, 9*C1)
    # s_ref / ss_ref : (SC1, 1) resident accumulators (constant index map).
    @pl.when(pl.program_id(0) == 0)
    def _():
        s_ref[...] = jnp.zeros_like(s_ref)
        ss_ref[...] = jnp.zeros_like(ss_ref)

    acc = jnp.dot(w1_ref[...], p_ref[...], preferred_element_type=jnp.float32)
    # TODO(synk): if the XLU ever binds, move these cross-lane sums onto the idle
    # MXU via a ones-column matmul; also consider shifted sums for variance.
    s_ref[...] += jnp.sum(acc, axis=1, keepdims=True)
    ss_ref[...] += jnp.sum(acc * acc, axis=1, keepdims=True)


def _mid_kernel(p_ref, w1_ref, sc1_ref, sh1_ref, w2_ref,
                z_ref, s2_ref, ss2_ref, *, approx):
    # Recompute conv1, apply bn1 + mish, 1x1 conv, accumulate bn2 stats, write z.
    @pl.when(pl.program_id(0) == 0)
    def _():
        s2_ref[...] = jnp.zeros_like(s2_ref)
        ss2_ref[...] = jnp.zeros_like(ss2_ref)

    acc = jnp.dot(w1_ref[...], p_ref[...], preferred_element_type=jnp.float32)
    y = _mish(acc * sc1_ref[...] + sh1_ref[...], approx)
    z = jnp.dot(w2_ref[...], y.astype(w2_ref.dtype),
                preferred_element_type=jnp.float32)
    s2_ref[...] += jnp.sum(z, axis=1, keepdims=True)
    ss2_ref[...] += jnp.sum(z * z, axis=1, keepdims=True)
    z_ref[...] = z


def _finalize_kernel(z_ref, sc2_ref, sh2_ref, o_ref, *, approx):
    o_ref[...] = _mish(z_ref[...] * sc2_ref[...] + sh2_ref[...], approx)


# ------------------------------ wrapper ------------------------------------ #
def _choose_block_m(m, compute_dtype):
    # Budget: ~2 bufs x (36 x Mt x elem) patches + (SC1 + 3*C2) x Mt x 4 B of live
    # f32 activations / z / output — stays under 32 MiB scoped VMEM on v7x.
    target = 32768 if compute_dtype == jnp.bfloat16 else 16384
    if m <= target:
        return m
    for t in range(target - target % 128, 127, -128):
        if m % t == 0:
            return t
    return m  # TODO(synk): pad + mask M if no aligned divisor exists at scale.


def fused_ibn(x_nchw, params, *, compute_dtype=jnp.bfloat16, approx_mish=True,
              block_m=None):
    N, C1, H, W = x_nchw.shape
    SC1 = params["w1"].shape[-1]
    C2 = params["w2"].shape[-1]
    M = N * H * W
    K1 = 9 * C1

    # Wrapper-side im2col in channels-first order -> kernel sees lane-dense
    # (channels, M) tensors (all stores are full unmasked vst).  Conv biases are
    # dropped: they cancel exactly against the train-mode batch mean inside BN.
    # TODO(synk): at non-toy M, build the 9 shifted patch rows inside the kernel
    # from a (C1, tile+halo) block instead of materializing the 9x im2col in HBM.
    xp = jnp.pad(x_nchw, ((0, 0), (0, 0), (1, 1), (1, 1)))
    slices = [xp[:, :, kh:kh + H, kw:kw + W]
              for kh in range(3) for kw in range(3)]              # 9 x (N,C1,H,W)
    patches = jnp.stack(slices, axis=0).transpose(0, 2, 1, 3, 4)  # (9,C1,N,H,W)
    patches = patches.reshape(K1, M).astype(compute_dtype)

    w1_k = params["w1"].reshape(K1, SC1).T.astype(compute_dtype)  # (SC1, K1)
    w2_k = params["w2"].T.astype(compute_dtype)                   # (C2, SC1)
    g1, be1 = params["g1"].T, params["be1"].T                     # (SC1, 1) f32
    g2, be2 = params["g2"].T, params["be2"].T                     # (C2, 1)  f32

    mt = block_m if block_m is not None else _choose_block_m(M, compute_dtype)
    assert M % mt == 0, (M, mt)
    grid = (M // mt,)

    p_spec = pl.BlockSpec((K1, mt), lambda i: (0, i))
    cm_spec = lambda c: pl.BlockSpec((c, mt), lambda i: (0, i))
    const = lambda r, c: pl.BlockSpec((r, c), lambda i: (0, 0))
    vec = lambda c: jax.ShapeDtypeStruct((c, 1), jnp.float32)

    cp_red = pltpu.CompilerParams(dimension_semantics=("arbitrary",),
                                  vmem_limit_bytes=_VMEM_LIMIT)
    cp_par = pltpu.CompilerParams(dimension_semantics=("parallel",),
                                  vmem_limit_bytes=_VMEM_LIMIT)

    # ---- pass 1: conv1 + bn1 batch statistics (serial reduction over M tiles).
    s1, ss1 = pl.pallas_call(
        _stats1_kernel,
        grid=grid,
        in_specs=[p_spec, const(SC1, K1)],
        out_specs=[const(SC1, 1), const(SC1, 1)],
        out_shape=[vec(SC1), vec(SC1)],
        compiler_params=cp_red,
    )(patches, w1_k)

    inv_m = 1.0 / M
    mu1 = s1 * inv_m
    var1 = jnp.maximum(ss1 * inv_m - mu1 * mu1, 0.0)
    scale1 = g1 * jax.lax.rsqrt(var1 + _EPS)
    shift1 = be1 - mu1 * scale1

    # ---- pass 2: recompute conv1 (K=36 matmul is cheap), bn1 + mish, 1x1 conv,
    # accumulate bn2 stats, write z (only C2 channels -> cheap to store).
    z, s2, ss2 = pl.pallas_call(
        functools.partial(_mid_kernel, approx=approx_mish),
        grid=grid,
        in_specs=[p_spec, const(SC1, K1), const(SC1, 1), const(SC1, 1),
                  const(C2, SC1)],
        out_specs=[cm_spec(C2), const(C2, 1), const(C2, 1)],
        out_shape=[jax.ShapeDtypeStruct((C2, M), jnp.float32), vec(C2), vec(C2)],
        compiler_params=cp_red,
    )(patches, w1_k, scale1, shift1, w2_k)

    mu2 = s2 * inv_m
    var2 = jnp.maximum(ss2 * inv_m - mu2 * mu2, 0.0)
    scale2 = g2 * jax.lax.rsqrt(var2 + _EPS)
    shift2 = be2 - mu2 * scale2

    # ---- pass 3: bn2 + mish (embarrassingly parallel over M tiles).
    out_cm = pl.pallas_call(
        functools.partial(_finalize_kernel, approx=approx_mish),
        grid=grid,
        in_specs=[cm_spec(C2), const(C2, 1), const(C2, 1)],
        out_specs=cm_spec(C2),
        out_shape=jax.ShapeDtypeStruct((C2, M), jnp.float32),
        compiler_params=cp_par,
    )(z, scale2, shift2)

    # (C2, N*H*W) -> NCHW
    return out_cm.reshape(C2, N, H, W).transpose(1, 0, 2, 3)


# ------------------------- pure-JAX reference ------------------------------ #
def fused_ibn_reference(x_nchw, params):
    eps = _EPS
    x = jnp.transpose(x_nchw, (0, 2, 3, 1))  # NHWC
    y = jax.lax.conv_general_dilated(
        x, params["w1"], window_strides=(1, 1), padding=((1, 1), (1, 1)),
        dimension_numbers=("NHWC", "HWIO", "NHWC")) + params["b1"][0]
    mu = jnp.mean(y, axis=(0, 1, 2), keepdims=True)
    var = jnp.mean((y - mu) ** 2, axis=(0, 1, 2), keepdims=True)
    y = (y - mu) * jax.lax.rsqrt(var + eps) * params["g1"][0] + params["be1"][0]
    y = _mish_exact(y)

    z = jnp.einsum("nhwc,cd->nhwd", y, params["w2"]) + params["b2"][0]
    mu2 = jnp.mean(z, axis=(0, 1, 2), keepdims=True)
    var2 = jnp.mean((z - mu2) ** 2, axis=(0, 1, 2), keepdims=True)
    z = (z - mu2) * jax.lax.rsqrt(var2 + eps) * params["g2"][0] + params["be2"][0]
    z = _mish_exact(z)
    return jnp.transpose(z, (0, 3, 1, 2))


# ------------------------------- main --------------------------------------- #
if __name__ == "__main__":
    # Module config: Fused_IBN(c1=4, c2=8, k=3, s=8, stride=1) -> sc1 = 32.
    c1, c2, s = 4, 8, 8
    sc1 = int(s * c1)
    N, H, W = 2, 16, 16

    key = jax.random.PRNGKey(0)
    ks = jax.random.split(key, 9)
    params = {
        "w1": 0.1 * jax.random.normal(ks[1], (3, 3, c1, sc1), jnp.float32),
        "b1": 0.1 * jax.random.normal(ks[2], (1, sc1), jnp.float32),
        "g1": 1.0 + 0.1 * jax.random.normal(ks[3], (1, sc1), jnp.float32),
        "be1": 0.1 * jax.random.normal(ks[4], (1, sc1), jnp.float32),
        "w2": 0.1 * jax.random.normal(ks[5], (sc1, c2), jnp.float32),
        "b2": 0.1 * jax.random.normal(ks[6], (1, c2), jnp.float32),
        "g2": 1.0 + 0.1 * jax.random.normal(ks[7], (1, c2), jnp.float32),
        "be2": 0.1 * jax.random.normal(ks[8], (1, c2), jnp.float32),
    }
    x = jax.random.normal(ks[0], (N, c1, H, W), jnp.float32)  # NCHW like PyTorch

    ref = jax.block_until_ready(fused_ibn_reference(x, params))

    # Fast path (default config): bf16 patch/weight streaming + approx-reciprocal
    # mish.  block_m=128 so the toy M=512 actually exercises the gridded, phased
    # BN path (4 tiles, cross-tile stat accumulation).
    fast = jax.jit(functools.partial(
        fused_ibn, compute_dtype=jnp.bfloat16, approx_mish=True, block_m=128))
    out_fast = jax.block_until_ready(fast(x, params))
    assert out_fast.shape == (N, c2, H, W), out_fast.shape
    err_fast = float(jnp.max(jnp.abs(out_fast - ref)))
    assert jnp.allclose(out_fast, ref, rtol=5e-2, atol=5e-2), err_fast

    # Strict path: f32 streams + exact divide -> matches the PyTorch module to 1e-4.
    strict = jax.jit(functools.partial(
        fused_ibn, compute_dtype=jnp.float32, approx_mish=False, block_m=128))
    out_strict = jax.block_until_ready(strict(x, params))
    err_strict = float(jnp.max(jnp.abs(out_strict - ref)))
    assert jnp.allclose(out_strict, ref, rtol=1e-4, atol=1e-4), err_strict

    print("KERNEL_OK")
</pallas_src>

<mosaic_0001>
module attributes {stable_mosaic.version = 11 : i64} {
  func.func @_stats1_kernel(%arg0: i32, %arg1: memref<36x128xbf16, #tpu.memory_space<vmem>>, %arg2: memref<32x36xbf16, #tpu.memory_space<vmem>>, %arg3: memref<32x1xf32, #tpu.memory_space<vmem>>, %arg4: memref<32x1xf32, #tpu.memory_space<vmem>>) attributes {dimension_semantics = [#tpu.dimension_semantics<arbitrary>], iteration_bounds = array<i64: 4>, scalar_prefetch = 0 : i64, scratch_operands = 0 : i64, tpu.core_type = #tpu.core_type<tc>, window_params = [{transform_indices = @transform_0, window_bounds = array<i64: 36, 128>}, {pipeline_mode = #tpu.pipeline_mode<synchronous>, transform_indices = @transform_1, window_bounds = array<i64: 32, 36>}, {pipeline_mode = #tpu.pipeline_mode<synchronous>, transform_indices = @transform_2, window_bounds = array<i64: 32, 1>}, {pipeline_mode = #tpu.pipeline_mode<synchronous>, transform_indices = @transform_3, window_bounds = array<i64: 32, 1>}]} {
    %c0_i32 = arith.constant 0 : i32
    %0 = arith.cmpi eq, %arg0, %c0_i32 : i32
    %1 = arith.extui %0 : i1 to i32
    %c0_i32_0 = arith.constant 0 : i32
    %2 = arith.cmpi ne, %1, %c0_i32_0 : i32
    scf.if %2 {
      %cst_14 = arith.constant 0.000000e+00 : f32
      %17 = vector.broadcast %cst_14 : f32 to vector<32x1xf32>
      %c0_15 = arith.constant 0 : index
      %c0_16 = arith.constant 0 : index
      %18 = vector.load %arg3[%c0_15, %c0_16] : memref<32x1xf32, #tpu.memory_space<vmem>>, vector<32x1xf32>
      tpu.vector_store %arg3[%c0_15, %c0_16], %17 {strides = array<i32>} : memref<32x1xf32, #tpu.memory_space<vmem>>, vector<32x1xf32>,
      %cst_17 = arith.constant 0.000000e+00 : f32
      %19 = vector.broadcast %cst_17 : f32 to vector<32x1xf32>
      %c0_18 = arith.constant 0 : index
      %c0_19 = arith.constant 0 : index
      %20 = vector.load %arg4[%c0_18, %c0_19] : memref<32x1xf32, #tpu.memory_space<vmem>>, vector<32x1xf32>
      tpu.vector_store %arg4[%c0_18, %c0_19], %19 {strides = array<i32>} : memref<32x1xf32, #tpu.memory_space<vmem>>, vector<32x1xf32>,
    } else {
    }
    %c0 = arith.constant 0 : index
    %c0_1 = arith.constant 0 : index
    %3 = vector.load %arg2[%c0, %c0_1] : memref<32x36xbf16, #tpu.memory_space<vmem>>, vector<32x36xbf16>
    %c0_2 = arith.constant 0 : index
    %c0_3 = arith.constant 0 : index
    %4 = vector.load %arg1[%c0_2, %c0_3] : memref<36x128xbf16, #tpu.memory_space<vmem>>, vector<36x128xbf16>
    %cst = arith.constant dense<0.000000e+00> : vector<32x128xf32>
    %5 = tpu.matmul %3, %4, %cst {dimension_numbers = #tpu.dot_dimension_numbers<[1], [0], [0], [1], [0, 0, 1, 1], [], []>} : vector<32x36xbf16>, vector<36x128xbf16>, vector<32x128xf32> -> vector<32x128xf32>
    %c0_4 = arith.constant 0 : index
    %c0_5 = arith.constant 0 : index
    %6 = vector.load %arg3[%c0_4, %c0_5] : memref<32x1xf32, #tpu.memory_space<vmem>>, vector<32x1xf32>
    %cst_6 = arith.constant dense<0.000000e+00> : vector<32xf32>
    %7 = vector.multi_reduction <add>, %5, %cst_6 [1] : vector<32x128xf32> to vector<32xf32>
    %8 = vector.shape_cast %7 : vector<32xf32> to vector<32x1xf32>
    %9 = arith.addf %6, %8 : vector<32x1xf32>
    %c0_7 = arith.constant 0 : index
    %c0_8 = arith.constant 0 : index
    %10 = vector.load %arg3[%c0_7, %c0_8] : memref<32x1xf32, #tpu.memory_space<vmem>>, vector<32x1xf32>
    tpu.vector_store %arg3[%c0_7, %c0_8], %9 {strides = array<i32>} : memref<32x1xf32, #tpu.memory_space<vmem>>, vector<32x1xf32>,
    %c0_9 = arith.constant 0 : index
    %c0_10 = arith.constant 0 : index
    %11 = vector.load %arg4[%c0_9, %c0_10] : memref<32x1xf32, #tpu.memory_space<vmem>>, vector<32x1xf32>
    %12 = arith.mulf %5, %5 : vector<32x128xf32>
    %cst_11 = arith.constant dense<0.000000e+00> : vector<32xf32>
    %13 = vector.multi_reduction <add>, %12, %cst_11 [1] : vector<32x128xf32> to vector<32xf32>
    %14 = vector.shape_cast %13 : vector<32xf32> to vector<32x1xf32>
    %15 = arith.addf %11, %14 : vector<32x1xf32>
    %c0_12 = arith.constant 0 : index
    %c0_13 = arith.constant 0 : index
    %16 = vector.load %arg4[%c0_12, %c0_13] : memref<32x1xf32, #tpu.memory_space<vmem>>, vector<32x1xf32>
    tpu.vector_store %arg4[%c0_12, %c0_13], %15 {strides = array<i32>} : memref<32x1xf32, #tpu.memory_space<vmem>>, vector<32x1xf32>,
    return
  }
  func.func @transform_0(%arg0: i32) -> (i32, i32) {
    %c0_i32 = arith.constant 0 : i32
    %c0_i32_0 = arith.constant 0 : i32
    return %c0_i32, %arg0 : i32, i32
  }
  func.func @transform_1(%arg0: i32) -> (i32, i32) {
    %c0_i32 = arith.constant 0 : i32
    %c0_i32_0 = arith.constant 0 : i32
    %c0_i32_1 = arith.constant 0 : i32
    return %c0_i32, %c0_i32_0 : i32, i32
  }
  func.func @transform_2(%arg0: i32) -> (i32, i32) {
    %c0_i32 = arith.constant 0 : i32
    %c0_i32_0 = arith.constant 0 : i32
    %c0_i32_1 = arith.constant 0 : i32
    return %c0_i32, %c0_i32_0 : i32, i32
  }
  func.func @transform_3(%arg0: i32) -> (i32, i32) {
    %c0_i32 = arith.constant 0 : i32
    %c0_i32_0 = arith.constant 0 : i32
    %c0_i32_1 = arith.constant 0 : i32
    return %c0_i32, %c0_i32_0 : i32, i32
  }
}

module attributes {stable_mosaic.version = 11 : i64} {
  func.func @_mid_kernel(%arg0: i32, %arg1: memref<36x128xbf16, #tpu.memory_space<vmem>>, %arg2: memref<32x36xbf16, #tpu.memory_space<vmem>>, %arg3: memref<32x1xf32, #tpu.memory_space<vmem>>, %arg4: memref<32x1xf32, #tpu.memory_space<vmem>>, %arg5: memref<8x32xbf16, #tpu.memory_space<vmem>>, %arg6: memref<8x128xf32, #tpu.memory_space<vmem>>, %arg7: memref<8x1xf32, #tpu.memory_space<vmem>>, %arg8: memref<8x1xf32, #tpu.memory_space<vmem>>) attributes {dimension_semantics = [#tpu.dimension_semantics<arbitrary>], iteration_bounds = array<i64: 4>, scalar_prefetch = 0 : i64, scratch_operands = 0 : i64, tpu.core_type = #tpu.core_type<tc>, window_params = [{transform_indices = @transform_0, window_bounds = array<i64: 36, 128>}, {pipeline_mode = #tpu.pipeline_mode<synchronous>, transform_indices = @transform_1, window_bounds = array<i64: 32, 36>}, {pipeline_mode = #tpu.pipeline_mode<synchronous>, transform_indices = @transform_2, window_bounds = array<i64: 32, 1>}, {pipeline_mode = #tpu.pipeline_mode<synchronous>, transform_indices = @transform_3, window_bounds = array<i64: 32, 1>}, {pipeline_mode = #tpu.pipeline_mode<synchronous>, transform_indices = @transform_4, window_bounds = array<i64: 8, 32>}, {transform_indices = @transform_5, window_bounds = array<i64: 8, 128>}, {pipeline_mode = #tpu.pipeline_mode<synchronous>, transform_indices = @transform_6, window_bounds = array<i64: 8, 1>}, {pipeline_mode = #tpu.pipeline_mode<synchronous>, transform_indices = @transform_7, window_bounds = array<i64: 8, 1>}]} {
    %c0_i32 = arith.constant 0 : i32
    %0 = arith.cmpi eq, %arg0, %c0_i32 : i32
    %1 = arith.extui %0 : i1 to i32
    %c0_i32_0 = arith.constant 0 : i32
    %2 = arith.cmpi ne, %1, %c0_i32_0 : i32
    scf.if %2 {
      %cst_26 = arith.constant 0.000000e+00 : f32
      %38 = vector.broadcast %cst_26 : f32 to vector<8x1xf32>
      %c0_27 = arith.constant 0 : index
      %c0_28 = arith.constant 0 : index
      %39 = vector.load %arg7[%c0_27, %c0_28] : memref<8x1xf32, #tpu.memory_space<vmem>>, vector<8x1xf32>
      tpu.vector_store %arg7[%c0_27, %c0_28], %38 {strides = array<i32>} : memref<8x1xf32, #tpu.memory_space<vmem>>, vector<8x1xf32>,
      %cst_29 = arith.constant 0.000000e+00 : f32
      %40 = vector.broadcast %cst_29 : f32 to vector<8x1xf32>
      %c0_30 = arith.constant 0 : index
      %c0_31 = arith.constant 0 : index
      %41 = vector.load %arg8[%c0_30, %c0_31] : memref<8x1xf32, #tpu.memory_space<vmem>>, vector<8x1xf32>
      tpu.vector_store %arg8[%c0_30, %c0_31], %40 {strides = array<i32>} : memref<8x1xf32, #tpu.memory_space<vmem>>, vector<8x1xf32>,
    } else {
    }
    %c0 = arith.constant 0 : index
    %c0_1 = arith.constant 0 : index
    %3 = vector.load %arg2[%c0, %c0_1] : memref<32x36xbf16, #tpu.memory_space<vmem>>, vector<32x36xbf16>
    %c0_2 = arith.constant 0 : index
    %c0_3 = arith.constant 0 : index
    %4 = vector.load %arg1[%c0_2, %c0_3] : memref<36x128xbf16, #tpu.memory_space<vmem>>, vector<36x128xbf16>
    %cst = arith.constant dense<0.000000e+00> : vector<32x128xf32>
    %5 = tpu.matmul %3, %4, %cst {dimension_numbers = #tpu.dot_dimension_numbers<[1], [0], [0], [1], [0, 0, 1, 1], [], []>} : vector<32x36xbf16>, vector<36x128xbf16>, vector<32x128xf32> -> vector<32x128xf32>
    %c0_4 = arith.constant 0 : index
    %c0_5 = arith.constant 0 : index
    %6 = vector.load %arg3[%c0_4, %c0_5] : memref<32x1xf32, #tpu.memory_space<vmem>>, vector<32x1xf32>
    %7 = vector.broadcast %6 : vector<32x1xf32> to vector<32x128xf32>
    %8 = arith.mulf %5, %7 : vector<32x128xf32>
    %c0_6 = arith.constant 0 : index
    %c0_7 = arith.constant 0 : index
    %9 = vector.load %arg4[%c0_6, %c0_7] : memref<32x1xf32, #tpu.memory_space<vmem>>, vector<32x1xf32>
    %10 = vector.broadcast %9 : vector<32x1xf32> to vector<32x128xf32>
    %11 = arith.addf %8, %10 : vector<32x128xf32>
    %cst_8 = arith.constant 2.000000e+01 : f32
    %12 = vector.broadcast %cst_8 : f32 to vector<32x128xf32>
    %13 = arith.minimumf %11, %12 : vector<32x128xf32>
    %14 = math.exp %13 : vector<32x128xf32>
    %cst_9 = arith.constant 2.000000e+00 : f32
    %15 = vector.broadcast %cst_9 : f32 to vector<32x128xf32>
    %16 = arith.addf %14, %15 : vector<32x128xf32>
    %17 = arith.mulf %14, %16 : vector<32x128xf32>
    %cst_10 = arith.constant 2.000000e+00 : f32
    %18 = vector.broadcast %cst_10 : f32 to vector<32x128xf32>
    %19 = arith.addf %17, %18 : vector<32x128xf32>
    %20 = tpu.reciprocal %19 {approx = true} : vector<32x128xf32> -> vector<32x128xf32>
    %21 = arith.mulf %17, %20 : vector<32x128xf32>
    %22 = arith.mulf %11, %21 : vector<32x128xf32>
    %c0_11 = arith.constant 0 : index
    %c0_12 = arith.constant 0 : index
    %23 = vector.load %arg5[%c0_11, %c0_12] : memref<8x32xbf16, #tpu.memory_space<vmem>>, vector<8x32xbf16>
    %24 = arith.truncf %22 : vector<32x128xf32> to vector<32x128xbf16>
    %cst_13 = arith.constant dense<0.000000e+00> : vector<8x128xf32>
    %25 = tpu.matmul %23, %24, %cst_13 {dimension_numbers = #tpu.dot_dimension_numbers<[1], [0], [0], [1], [0, 0, 1, 1], [], []>} : vector<8x32xbf16>, vector<32x128xbf16>, vector<8x128xf32> -> vector<8x128xf32>
    %c0_14 = arith.constant 0 : index
    %c0_15 = arith.constant 0 : index
    %26 = vector.load %arg7[%c0_14, %c0_15] : memref<8x1xf32, #tpu.memory_space<vmem>>, vector<8x1xf32>
    %cst_16 = arith.constant dense<0.000000e+00> : vector<8xf32>
    %27 = vector.multi_reduction <add>, %25, %cst_16 [1] : vector<8x128xf32> to vector<8xf32>
    %28 = vector.shape_cast %27 : vector<8xf32> to vector<8x1xf32>
    %29 = arith.addf %26, %28 : vector<8x1xf32>
    %c0_17 = arith.constant 0 : index
    %c0_18 = arith.constant 0 : index
    %30 = vector.load %arg7[%c0_17, %c0_18] : memref<8x1xf32, #tpu.memory_space<vmem>>, vector<8x1xf32>
    tpu.vector_store %arg7[%c0_17, %c0_18], %29 {strides = array<i32>} : memref<8x1xf32, #tpu.memory_space<vmem>>, vector<8x1xf32>,
    %c0_19 = arith.constant 0 : index
    %c0_20 = arith.constant 0 : index
    %31 = vector.load %arg8[%c0_19, %c0_20] : memref<8x1xf32, #tpu.memory_space<vmem>>, vector<8x1xf32>
    %32 = arith.mulf %25, %25 : vector<8x128xf32>
    %cst_21 = arith.constant dense<0.000000e+00> : vector<8xf32>
    %33 = vector.multi_reduction <add>, %32, %cst_21 [1] : vector<8x128xf32> to vector<8xf32>
    %34 = vector.shape_cast %33 : vector<8xf32> to vector<8x1xf32>
    %35 = arith.addf %31, %34 : vector<8x1xf32>
    %c0_22 = arith.constant 0 : index
    %c0_23 = arith.constant 0 : index
    %36 = vector.load %arg8[%c0_22, %c0_23] : memref<8x1xf32, #tpu.memory_space<vmem>>, vector<8x1xf32>
    tpu.vector_store %arg8[%c0_22, %c0_23], %35 {strides = array<i32>} : memref<8x1xf32, #tpu.memory_space<vmem>>, vector<8x1xf32>,
    %c0_24 = arith.constant 0 : index
    %c0_25 = arith.constant 0 : index
    %37 = vector.load %arg6[%c0_24, %c0_25] : memref<8x128xf32, #tpu.memory_space<vmem>>, vector<8x128xf32>
    tpu.vector_store %arg6[%c0_24, %c0_25], %25 {strides = array<i32>} : memref<8x128xf32, #tpu.memory_space<vmem>>, vector<8x128xf32>,
    return
  }
  func.func @transform_0(%arg0: i32) -> (i32, i32) {
    %c0_i32 = arith.constant 0 : i32
    %c0_i32_0 = arith.constant 0 : i32
    return %c0_i32, %arg0 : i32, i32
  }
  func.func @transform_1(%arg0: i32) -> (i32, i32) {
    %c0_i32 = arith.constant 0 : i32
    %c0_i32_0 = arith.constant 0 : i32
    %c0_i32_1 = arith.constant 0 : i32
    return %c0_i32, %c0_i32_0 : i32, i32
  }
  func.func @transform_2(%arg0: i32) -> (i32, i32) {
    %c0_i32 = arith.constant 0 : i32
    %c0_i32_0 = arith.constant 0 : i32
    %c0_i32_1 = arith.constant 0 : i32
    return %c0_i32, %c0_i32_0 : i32, i32
  }
  func.func @transform_3(%arg0: i32) -> (i32, i32) {
    %c0_i32 = arith.constant 0 : i32
    %c0_i32_0 = arith.constant 0 : i32
    %c0_i32_1 = arith.constant 0 : i32
    return %c0_i32, %c0_i32_0 : i32, i32
  }
  func.func @transform_4(%arg0: i32) -> (i32, i32) {
    %c0_i32 = arith.constant 0 : i32
    %c0_i32_0 = arith.constant 0 : i32
    %c0_i32_1 = arith.constant 0 : i32
    return %c0_i32, %c0_i32_0 : i32, i32
  }
  func.func @transform_5(%arg0: i32) -> (i32, i32) {
    %c0_i32 = arith.constant 0 : i32
    %c0_i32_0 = arith.constant 0 : i32
    return %c0_i32, %arg0 : i32, i32
  }
  func.func @transform_6(%arg0: i32) -> (i32, i32) {
    %c0_i32 = arith.constant 0 : i32
    %c0_i32_0 = arith.constant 0 : i32
    %c0_i32_1 = arith.constant 0 : i32
    return %c0_i32, %c0_i32_0 : i32, i32
  }
  func.func @transform_7(%arg0: i32) -> (i32, i32) {
    %c0_i32 = arith.constant 0 : i32
    %c0_i32_0 = arith.constant 0 : i32
    %c0_i32_1 = arith.constant 0 : i32
    return %c0_i32, %c0_i32_0 : i32, i32
  }
}

module attributes {stable_mosaic.version = 11 : i64} {
  func.func @_finalize_kernel(%arg0: i32, %arg1: memref<8x128xf32, #tpu.memory_space<vmem>>, %arg2: memref<8x1xf32, #tpu.memory_space<vmem>>, %arg3: memref<8x1xf32, #tpu.memory_space<vmem>>, %arg4: memref<8x128xf32, #tpu.memory_space<vmem>>) attributes {dimension_semantics = [#tpu.dimension_semantics<parallel>], iteration_bounds = array<i64: 4>, scalar_prefetch = 0 : i64, scratch_operands = 0 : i64, tpu.core_type = #tpu.core_type<tc>, window_params = [{transform_indices = @transform_0, window_bounds = array<i64: 8, 128>}, {pipeline_mode = #tpu.pipeline_mode<synchronous>, transform_indices = @transform_1, window_bounds = array<i64: 8, 1>}, {pipeline_mode = #tpu.pipeline_mode<synchronous>, transform_indices = @transform_2, window_bounds = array<i64: 8, 1>}, {transform_indices = @transform_3, window_bounds = array<i64: 8, 128>}]} {
    %c0 = arith.constant 0 : index
    %c0_0 = arith.constant 0 : index
    %0 = vector.load %arg1[%c0, %c0_0] : memref<8x128xf32, #tpu.memory_space<vmem>>, vector<8x128xf32>
    %c0_1 = arith.constant 0 : index
    %c0_2 = arith.constant 0 : index
    %1 = vector.load %arg2[%c0_1, %c0_2] : memref<8x1xf32, #tpu.memory_space<vmem>>, vector<8x1xf32>
    %2 = vector.broadcast %1 : vector<8x1xf32> to vector<8x128xf32>
    %3 = arith.mulf %0, %2 : vector<8x128xf32>
    %c0_3 = arith.constant 0 : index
    %c0_4 = arith.constant 0 : index
    %4 = vector.load %arg3[%c0_3, %c0_4] : memref<8x1xf32, #tpu.memory_space<vmem>>, vector<8x1xf32>
    %5 = vector.broadcast %4 : vector<8x1xf32> to vector<8x128xf32>
    %6 = arith.addf %3, %5 : vector<8x128xf32>
    %cst = arith.constant 2.000000e+01 : f32
    %7 = vector.broadcast %cst : f32 to vector<8x128xf32>
    %8 = arith.minimumf %6, %7 : vector<8x128xf32>
    %9 = math.exp %8 : vector<8x128xf32>
    %cst_5 = arith.constant 2.000000e+00 : f32
    %10 = vector.broadcast %cst_5 : f32 to vector<8x128xf32>
    %11 = arith.addf %9, %10 : vector<8x128xf32>
    %12 = arith.mulf %9, %11 : vector<8x128xf32>
    %cst_6 = arith.constant 2.000000e+00 : f32
    %13 = vector.broadcast %cst_6 : f32 to vector<8x128xf32>
    %14 = arith.addf %12, %13 : vector<8x128xf32>
    %15 = tpu.reciprocal %14 {approx = true} : vector<8x128xf32> -> vector<8x128xf32>
    %16 = arith.mulf %12, %15 : vector<8x128xf32>
    %17 = arith.mulf %6, %16 : vector<8x128xf32>
    %c0_7 = arith.constant 0 : index
    %c0_8 = arith.constant 0 : index
    %18 = vector.load %arg4[%c0_7, %c0_8] : memref<8x128xf32, #tpu.memory_space<vmem>>, vector<8x128xf32>
    tpu.vector_store %arg4[%c0_7, %c0_8], %17 {strides = array<i32>} : memref<8x128xf32, #tpu.memory_space<vmem>>, vector<8x128xf32>,
    return
  }
  func.func @transform_0(%arg0: i32) -> (i32, i32) {
    %c0_i32 = arith.constant 0 : i32
    %c0_i32_0 = arith.constant 0 : i32
    return %c0_i32, %arg0 : i32, i32
  }
  func.func @transform_1(%arg0: i32) -> (i32, i32) {
    %c0_i32 = arith.constant 0 : i32
    %c0_i32_0 = arith.constant 0 : i32
    %c0_i32_1 = arith.constant 0 : i32
    return %c0_i32, %c0_i32_0 : i32, i32
  }
  func.func @transform_2(%arg0: i32) -> (i32, i32) {
    %c0_i32 = arith.constant 0 : i32
    %c0_i32_0 = arith.constant 0 : i32
    %c0_i32_1 = arith.constant 0 : i32
    return %c0_i32, %c0_i32_0 : i32, i32
  }
  func.func @transform_3(%arg0: i32) -> (i32, i32) {
    %c0_i32 = arith.constant 0 : i32
    %c0_i32_0 = arith.constant 0 : i32
    return %c0_i32, %arg0 : i32, i32
  }
}

</mosaic_0001>

<bundles_post_ra>
// kernel: fused_ibn.3
= control target key start
LH: loop header
LB: loop body
LE: loop exit
PB: predicated region body
PF: predicated region fallthrough
CT: control target
= control target key end

     0   :  { %s512_s12 = smov 0   ;;  %s514_s13 = smov 0   ;;  %s647_s0 = inlined_call_operand.vmem [shape: bf16[36,512], index: 0, kind: input, shape index: {}]   ;;  %s648_s1 = inlined_call_operand.vmem [shape: bf16[32,36], index: 1, kind: input, shape index: {}]   ;;  %s649_s2 = inlined_call_operand.vmem [shape: f32[32,1], index: 2, kind: output, shape index: {0}]   ;;  %s650_s3 = inlined_call_operand.vmem [shape: f32[32,1], index: 3, kind: output, shape index: {1}]  }
   0x1   :  { %s516_s14 = smov 0  }
   0x2 LB: > { %s404_s15 = sadd.s32 4294967295, %s489_s14   ;;  %s529_s16 = sadd.s32 1, %s489_s14   ;;  %s489_s14 = sphi %s516_s14, %s653_s14   ;;  %s485_s13 = sphi %s514_s13, %s652_s13   ;;  %s481_s12 = sphi %s512_s12, %s651_s12  }
   0x3   : > { %s18_s17 = ssub.s32 %s489_s14, %s529_s16  ;;  %s21_s18 = sadd.s32 1, %s485_s13 }
   0x4   : > { %p19_p0 = scmp.eq.s32.totalorder %s18_s17, 0  ;;  %p28_p1 = scmp.ne.s32.totalorder %s485_s13, %s481_s12 }
   0x5   : > { %p29_p2 = scmp.eq.s32.totalorder %s489_s14, 0  ;;  %p406_p4 = scmp.ge.s32.totalorder %s489_s14, 4 }
   0x6   : > { %s538_s19 = scalar_select %p19_p0, %s485_s13, %s21_s18  }
   0x7   : > { %p30_p3 = por %p29_p2, %p28_p1  ;;  %120 = sbr.rel (%p406_p4) target bundleno = 21 (0x15), region = 20 }
   0xe   : > { %123 = sbr.rel (!%p30_p3) target bundleno = 21 (0x15), region = 24  ;;  %s125_s20 = sand.u32 (%p30_p3), 1, %s485_s13  }
   0xf   : > { %s407_s21 = sshll.u32 (%p30_p3), %s489_s14, 2  ;;  %s435_s22 = smul.u32 (%p30_p3), 20, %s125_s20 }
  0x10   : > { %s129_s25 = scalar_lea.vmem (%p30_p3), %s647_s0, %s407_s21 }
  0x11   : > { %v145_v0 = vld [vmem:[%s129_s25] sm:$0xf] (%p30_p3)  ;;  %v147_v1 = vld [vmem:[%s129_s25 + $0x10] sm:$0xf] (%p30_p3)  ;;  %s127_s26 = scalar_lea.vmem (%p30_p3), [#allocation2], %s435_s22 }
  0x12   : > { %v149_v2 = vld [vmem:[%s129_s25 + $0x20] sm:$0xf] (%p30_p3)  ;;  %v151_v3 = vld [vmem:[%s129_s25 + $0x30] sm:$0xf] (%p30_p3)  ;;  %146 = vst [vmem:[%s127_s26] sm:$0xf] (%p30_p3), %v145_v0 }
  0x13   : > { %v153_v4 = vld [vmem:[%s129_s25 + $0x40] sm:$0xf] (%p30_p3)  ;;  %148 = vst [vmem:[%s127_s26 + $0x4] sm:$0xf] (%p30_p3), %v147_v1  ;;  %150 = vst [vmem:[%s127_s26 + $0x8] sm:$0xf] (%p30_p3), %v149_v2 }
  0x14   : > { %152 = vst [vmem:[%s127_s26 + $0xc] sm:$0xf] (%p30_p3), %v151_v3  ;;  %154 = vst [vmem:[%s127_s26 + $0x10] sm:$0xf] (%p30_p3), %v153_v4 }
  0x15 PF: > { %p408_p5 = scmp.ge.s32.totalorder %s489_s14, 1  ;;  %p186_p6 = scmp.lt.s32.totalorder %s489_s14, 5 }
  0x17   : > { %p187_p7 = pnand %p408_p5, %p186_p6 }
  0x18   : > { %s193_s27 = sand.u32 (!%p187_p7), 1, %s481_s12   ;;  %p409_p8 = scmp.ne.s32.totalorder (!%p187_p7), %s404_s15, 0 }
  0x19   : > { %190 = sbr.rel (%p187_p7) target bundleno = 422 (0x1a6), region = 65 }
  0x1a   : > { %s436_s28 = smul.u32 (!%p187_p7), 20, %s193_s27 }
  0x1c   : > { %s195_s29 = scalar_lea.vmem (!%p187_p7), [#allocation2], %s436_s28 }
  0x20   : > { %215 = sbr.rel (%p409_p8) target bundleno = 39 (0x27), region = 73  ;;  %vm216_vm0 = vcmask (!%p409_p8), 7168   ;;  %v491_v5 = vmov (!%p409_p8), 0.0  }
  0x21   : > { %217 = vst.msk [vmem:[%s649_s2] sm:$0xff] (!%p409_p8), %vm216_vm0, %v491_v5  ;;  %218 = vst.msk [vmem:[%s649_s2 + $0x8] sm:$0xff] (!%p409_p8), %vm216_vm0, %v491_v5 }
  0x22   : > { %219 = vst.msk [vmem:[%s649_s2 + $0x10] sm:$0xff] (!%p409_p8), %vm216_vm0, %v491_v5  ;;  %220 = vst.msk [vmem:[%s649_s2 + $0x18] sm:$0xff] (!%p409_p8), %vm216_vm0, %v491_v5 }
  0x23   : > { %221 = vst.msk [vmem:[%s650_s3] sm:$0xff] (!%p409_p8), %vm216_vm0, %v491_v5  ;;  %222 = vst.msk [vmem:[%s650_s3 + $0x8] sm:$0xff] (!%p409_p8), %vm216_vm0, %v491_v5 }
  0x24   : > { %223 = vst.msk [vmem:[%s650_s3 + $0x10] sm:$0xff] (!%p409_p8), %vm216_vm0, %v491_v5  ;;  %224 = vst.msk [vmem:[%s650_s3 + $0x18] sm:$0xff] (!%p409_p8), %vm216_vm0, %v491_v5 }
  0x27 PF: > { %v462_v6 = vld [vmem:[%s195_s29] sm:$0xff]   ;;  %v463_v7 = vld [vmem:[%s195_s29 + $0x8] sm:$0xff]   ;;  %vm259_vm1 = vcmask 293888   ;;  %v464_v9 = vld [vmem:[%s195_s29 + $0x10] ss:$0 sps:$4 sm:$0x33]  }
  0x28   : > { %424 = vmatprep.subr.bf16.mxu0 %v462_v6  ;;  %v465_v8 = vld [vmem:[%s648_s1] sm:$0xff]   ;;  %vm266_vm2 = vcmask 1041408   ;;  %v466_v11 = vld [vmem:[%s648_s1 + $0x8] sm:$0xff]   ;;  %vm335_vm3 = vcmask 7168  }
  0x29   : > { %425 = vmatpush3.bf16.msra.mxu0 %v462_v6  ;;  %430 = vmatprep.mubr.msk.bf16.mxu0 %vm259_vm1, %v465_v8  ;;  %v268_v10 = vsel %vm266_vm2, %v464_v9, 0  ;;  %v321_v20 = vld [vmem:[%s649_s2 + $0x10] sm:$0xff]  ;;  %v319_v21 = vld [vmem:[%s649_s2] sm:$0xff]  ;;  %v322_v26 = vld [vmem:[%s649_s2 + $0x18] sm:$0xff] }
  0x2a   : > { %426 = vmatprep.subr.bf16.mxu0 %v463_v7  ;;  %v320_v27 = vld [vmem:[%s649_s2 + $0x8] sm:$0xff]  ;;  %v340_v33 = vld [vmem:[%s650_s3] sm:$0xff] }
  0x2b   : > { %v341_v32 = vld [vmem:[%s650_s3 + $0x8] sm:$0xff]  ;;  %v343_v38 = vld [vmem:[%s650_s3 + $0x18] sm:$0xff]  ;;  %v342_v39 = vld [vmem:[%s650_s3 + $0x10] sm:$0xff] }
  0x2d   : > { %427 = vmatpush3.bf16.msra.mxu0 %v463_v7 }
  0x2e   : > { %434 = vmatprep.subr.msk.bf16.mxu0 %vm266_vm2, %v464_v9 }
  0x31   : > { %429 = vmatpush3.bf16.msra.mxu0 %v268_v10 }
  0x34   : > { %431 = vmatmul.mubr.msk.bf16.vlgmr.msra.gmra.mrb[0].mxu0 %vm259_vm1, %v466_v11 }
 0x107   : > { %v432_v12 = vpop.f32.mrb[0].mxu0 }
 0x108   : > { %327 = vadd.xlane.f32.xlu1 %v432_v12  ;;  %v304_v13 = vpop.f32.mrb[1].mxu0  ;;  %v346_v19 = vmul.f32 %v432_v12, %v432_v12 }
 0x109   : > { %323 = vadd.xlane.f32.xlu0 %v304_v13  ;;  %v433_v14 = vpop.f32.mrb[2].mxu0  ;;  %v344_v17 = vmul.f32 %v304_v13, %v304_v13 }
 0x10a   : > { %v307_v15 = vpop.f32.mrb[3].mxu0  ;;  %v347_v18 = vmul.f32 %v433_v14, %v433_v14 }
 0x10b   : > { %v345_v16 = vmul.f32 %v307_v15, %v307_v15 }
 0x10c   : > { %329 = vadd.xlane.f32.xlu1 %v433_v14 }
 0x10d   : > { %325 = vadd.xlane.f32.xlu0 %v307_v15 }
 0x110   : > { %350 = vadd.xlane.f32.xlu1 %v345_v16 }
 0x111   : > { %348 = vadd.xlane.f32.xlu0 %v344_v17 }
 0x114   : > { %354 = vadd.xlane.f32.xlu1 %v347_v18 }
 0x115   : > { %352 = vadd.xlane.f32.xlu0 %v346_v19 }
 0x195   : > { %v328_v22 = vpop.xlane.xlu1 %327 }
 0x196   : > { %v333_v23 = vadd.f32 %v328_v22, %v321_v20  ;;  %v324_v24 = vpop.xlane.xlu0 %323 }
 0x197   : > { %v331_v25 = vadd.f32 %v324_v24, %v319_v21 }
 0x198   : > { %338 = vst.msk [vmem:[%s649_s2 + $0x10] sm:$0xff] %vm335_vm3, %v333_v23 }
 0x199   : > { %336 = vst.msk [vmem:[%s649_s2] sm:$0xff] %vm335_vm3, %v331_v25  ;;  %v330_v28 = vpop.xlane.xlu1 %329 }
 0x19a   : > { %v334_v29 = vadd.f32 %v330_v28, %v322_v26  ;;  %v326_v30 = vpop.xlane.xlu0 %325 }
 0x19b   : > { %v332_v31 = vadd.f32 %v326_v30, %v320_v27 }
 0x19c   : > { %339 = vst.msk [vmem:[%s649_s2 + $0x18] sm:$0xff] %vm335_vm3, %v334_v29 }
 0x19d   : > { %337 = vst.msk [vmem:[%s649_s2 + $0x8] sm:$0xff] %vm335_vm3, %v332_v31  ;;  %v351_v34 = vpop.xlane.xlu1 %350 }
 0x19e   : > { %v357_v35 = vadd.f32 %v351_v34, %v341_v32  ;;  %v349_v36 = vpop.xlane.xlu0 %348 }
 0x19f   : > { %v356_v37 = vadd.f32 %v349_v36, %v340_v33 }
 0x1a0   : > { %361 = vst.msk [vmem:[%s650_s3 + $0x8] sm:$0xff] %vm335_vm3, %v357_v35 }
 0x1a1   : > { %360 = vst.msk [vmem:[%s650_s3] sm:$0xff] %vm335_vm3, %v356_v37  ;;  %v355_v40 = vpop.xlane.xlu1 %354 }
 0x1a2   : > { %v359_v41 = vadd.f32 %v355_v40, %v343_v38  ;;  %v353_v42 = vpop.xlane.xlu0 %352 }
 0x1a3   : > { %v358_v43 = vadd.f32 %v353_v42, %v342_v39 }
 0x1a4   : > { %363 = vst.msk [vmem:[%s650_s3 + $0x18] sm:$0xff] %vm335_vm3, %v359_v41 }
 0x1a5   : > { %362 = vst.msk [vmem:[%s650_s3 + $0x10] sm:$0xff] %vm335_vm3, %v358_v43 }
 0x1a6 PF: > { %p11_p9 = scmp.ge.s32.totalorder %s529_s16, 6   ;;  %s651_s12 = smov %s485_s13 }
 0x1a7   : > { %s652_s13 = smov %s538_s19  ;;  %s653_s14 = smov %s529_s16 }
 0x1a8   :  { %13 = sbr.rel (!%p11_p9) target bundleno = 2 (0x2), region = 112 }

// kernel: fused_ibn.5
= control target key start
LH: loop header
LB: loop body
LE: loop exit
PB: predicated region body
PF: predicated region fallthrough
CT: control target
= control target key end

     0   :  { %s296_s12 = smov 0   ;;  %s319_s0 = inlined_call_operand.vmem [shape: f32[8,512], index: 0, kind: input, shape index: {}]   ;;  %s320_s1 = inlined_call_operand.vmem [shape: f32[8,1], index: 1, kind: input, shape index: {}]   ;;  %s321_s2 = inlined_call_operand.vmem [shape: f32[8,1], index: 2, kind: input, shape index: {}]   ;;  %s322_s3 = inlined_call_operand.vmem [shape: f32[8,512], index: 3, kind: output, shape index: {}]  }
   0x1 LB: > { %s244_s13 = sadd.s32 4294967295, %s273_s12   ;;  %p248_p0 = scmp.ge.s32.totalorder %s273_s12, 1  ;;  %s273_s12 = sphi %s296_s12, %s13_s12  }
   0x2   : > { %p136_p1 = scmp.lt.s32.totalorder %s273_s12, 5 }
   0x4   : > { %p137_p2 = pnand %p248_p0, %p136_p1 }
   0x5   : > { %v167_v0 = vld [vmem:[%s320_s1] sm:$0xff] (!%p137_p2)  ;;  %v275_v1 = vmov (!%p137_p2), 0   ;;  %p158_p3 = scmp.lt.s32.totalorder (!%p137_p2), %s244_s13, 3 }
   0x6   : > { %140 = sbr.rel (%p137_p2) target bundleno = 178 (0xb2), region = 32  ;;  %262 = vset.pattern.permute.xlu0 (!%p137_p2), %v275_v1  ;;  %v174_v2 = vld [vmem:[%s321_s2] sm:$0xff] (!%p137_p2) }
   0x7   : > { %170 = vperm.xlu0 (!%p137_p2), %262, %v167_v0  }
   0xb   : > { %177 = vperm.xlu0 (!%p137_p2), %262, %v174_v2  }
   0xd   : > { %s324_s13 = smov (!%p158_p3, %s244_s13), 3 }
   0xe   : > { %s249_s18 = sshll.u32 %s324_s13, 3 }
   0xf   : > { %s161_s21 = scalar_lea.vmem %s319_s0, %s249_s18  ;;  %s165_s24 = scalar_lea.vmem %s322_s3, %s249_s18 }
  0x10   : > { %v166_v4 = vld [vmem:[%s161_s21] sm:$0xff] }
  0x86   : > { %v171_v3 = vpop.permute.xlu0 %170 }
  0x87   : > { %v173_v5 = vmul.f32 %v171_v3, %v166_v4 }
  0x8a   : > { %v178_v6 = vpop.permute.xlu0 %177 }
  0x8b   : > { %v180_v7 = vadd.f32 %v178_v6, %v173_v5 }
  0x8d   : > { %v181_v8 = vmin.f32 %v180_v7, 20.0 }
  0x8f   : > { %v182_v9 = vmul.f32 1.442695, %v181_v8 }
  0x91   : > { %263 = vpow2.f32 %v182_v9 }
  0x9b   : > { %v264_v10 = vpop.eup %263 }
  0x9c   : > { %v184_v11 = vadd.f32 2.0, %v264_v10 }
  0x9e   : > { %v185_v12 = vmul.f32 %v264_v10, %v184_v11 }
  0xa0   : > { %v186_v13 = vadd.f32 2.0, %v185_v12 }
  0xa2   : > { %265 = vrcp.f32 %v186_v13 }
  0xac   : > { %v266_v14 = vpop.eup %265 }
  0xad   : > { %v188_v15 = vmul.f32 %v266_v14, %v185_v12 }
  0xaf   : > { %v189_v16 = vmul.f32 %v188_v15, %v180_v7 }
  0xb1   : > { %190 = vst [vmem:[%s165_s24] sm:$0xff] %v189_v16 }
  0xb2 PF: > { %s13_s12 = sadd.s32 1, %s273_s12  }
  0xb3   : > { %p10_p4 = scmp.ge.s32.totalorder %s13_s12, 6  }
  0xb5   :  { %12 = sbr.rel (!%p10_p4) target bundleno = 1 (0x1), region = 62 }

// kernel: fused_ibn.4
= control target key start
LH: loop header
LB: loop body
LE: loop exit
PB: predicated region body
PF: predicated region fallthrough
CT: control target
= control target key end

     0   :  { %s820_s24 = smov 0   ;;  %s822_s25 = smov 0   ;;  %s934_s0 = inlined_call_operand.vmem [shape: bf16[36,512], index: 0, kind: input, shape index: {}]   ;;  %s935_s1 = inlined_call_operand.vmem [shape: bf16[32,36], index: 1, kind: input, shape index: {}]   ;;  %s936_s2 = inlined_call_operand.vmem [shape: f32[32,1], index: 2, kind: input, shape index: {}]   ;;  %s937_s3 = inlined_call_operand.vmem [shape: f32[32,1], index: 3, kind: input, shape index: {}]   ;;  %s938_s4 = inlined_call_operand.vmem [shape: bf16[8,32], index: 4, kind: input, shape index: {}]   ;;  %s939_s5 = inlined_call_operand.vmem [shape: f32[8,512], index: 5, kind: output, shape index: {0}]   ;;  %s940_s6 = inlined_call_operand.vmem [shape: f32[8,1], index: 6, kind: output, shape index: {1}]   ;;  %s941_s7 = inlined_call_operand.vmem [shape: f32[8,1], index: 7, kind: output, shape index: {2}]  }
   0x1   :  { %s824_s26 = smov 0  }
   0x2 LB: > { %s836_s27 = sadd.s32 4294967295, %s774_s26   ;;  %s839_s28 = sadd.s32 1, %s774_s26   ;;  %s774_s26 = sphi %s824_s26, %s944_s26   ;;  %s770_s25 = sphi %s822_s25, %s943_s25   ;;  %s766_s24 = sphi %s820_s24, %s942_s24  }
   0x3   : > { %s22_s29 = ssub.s32 %s774_s26, %s839_s28  ;;  %s25_s30 = sadd.s32 1, %s770_s25 }
   0x4   : > { %p23_p0 = scmp.eq.s32.totalorder %s22_s29, 0  ;;  %p32_p1 = scmp.ne.s32.totalorder %s770_s25, %s766_s24 }
   0x5   : > { %p33_p2 = scmp.eq.s32.totalorder %s774_s26, 0  ;;  %p657_p4 = scmp.ge.s32.totalorder %s774_s26, 4 }
   0x6   : > { %s848_s8 = scalar_select %p23_p0, %s770_s25, %s25_s30  }
   0x7   : > { %p34_p3 = por %p33_p2, %p32_p1  ;;  %222 = sbr.rel (%p657_p4) target bundleno = 21 (0x15), region = 32 }
   0xe   : > { %225 = sbr.rel (!%p34_p3) target bundleno = 21 (0x15), region = 36  ;;  %s227_s9 = sand.u32 (%p34_p3), 1, %s770_s25  }
   0xf   : > { %s658_s10 = sshll.u32 (%p34_p3), %s774_s26, 2  ;;  %s699_s11 = smul.u32 (%p34_p3), 20, %s227_s9 }
  0x10   : > { %s231_s14 = scalar_lea.vmem (%p34_p3), %s934_s0, %s658_s10 }
  0x11   : > { %v247_v0 = vld [vmem:[%s231_s14] sm:$0xf] (%p34_p3)  ;;  %v249_v1 = vld [vmem:[%s231_s14 + $0x10] sm:$0xf] (%p34_p3)  ;;  %s229_s15 = scalar_lea.vmem (%p34_p3), [#allocation2], %s699_s11 }
  0x12   : > { %v251_v2 = vld [vmem:[%s231_s14 + $0x20] sm:$0xf] (%p34_p3)  ;;  %v253_v3 = vld [vmem:[%s231_s14 + $0x30] sm:$0xf] (%p34_p3)  ;;  %248 = vst [vmem:[%s229_s15] sm:$0xf] (%p34_p3), %v247_v0 }
  0x13   : > { %v255_v4 = vld [vmem:[%s231_s14 + $0x40] sm:$0xf] (%p34_p3)  ;;  %250 = vst [vmem:[%s229_s15 + $0x4] sm:$0xf] (%p34_p3), %v249_v1  ;;  %252 = vst [vmem:[%s229_s15 + $0x8] sm:$0xf] (%p34_p3), %v251_v2 }
  0x14   : > { %254 = vst [vmem:[%s229_s15 + $0xc] sm:$0xf] (%p34_p3), %v253_v3  ;;  %256 = vst [vmem:[%s229_s15 + $0x10] sm:$0xf] (%p34_p3), %v255_v4 }
  0x15 PF: > { %p659_p5 = scmp.ge.s32.totalorder %s774_s26, 1  ;;  %p288_p6 = scmp.lt.s32.totalorder %s774_s26, 5 }
  0x17   : > { %p289_p7 = pnand %p659_p5, %p288_p6 }
  0x18   : > { %s295_s16 = sand.u32 (!%p289_p7), 1, %s766_s24   ;;  %p325_p8 = scmp.lt.s32.totalorder (!%p289_p7), %s836_s27, 3 }
  0x19   : > { %292 = sbr.rel (%p289_p7) target bundleno = 676 (0x2a4), region = 77  ;;  %p661_p9 = scmp.ne.s32.totalorder (!%p289_p7), %s836_s27, 0 }
  0x1a   : > { %s700_s17 = smul.u32 (!%p289_p7), 20, %s295_s16 }
  0x1c   : > { %s297_s23 = scalar_lea.vmem (!%p289_p7), [#allocation2], %s700_s17 }
  0x20   : > { %s326_s18 = scalar_select %p325_p8, %s836_s27, 3 }
  0x21   : > { %333 = sbr.rel (%p661_p9) target bundleno = 40 (0x28), region = 85  ;;  %vm334_vm0 = vcmask (!%p661_p9), 7168   ;;  %v776_v5 = vmov (!%p661_p9), 0.0  }
  0x22   : > { %s660_s19 = sshll.u32 %s326_s18, 3  ;;  %335 = vst.msk [vmem:[%s940_s6] sm:$0xff] (!%p661_p9), %vm334_vm0, %v776_v5  ;;  %336 = vst.msk [vmem:[%s941_s7] sm:$0xff] (!%p661_p9), %vm334_vm0, %v776_v5 }
  0x23   : > { %s864_s22 = scalar_lea.vmem %s939_s5, %s660_s19 }
  0x28 PF: > { %v731_v6 = vld [vmem:[%s297_s23] sm:$0xff]   ;;  %v732_v7 = vld [vmem:[%s297_s23 + $0x8] sm:$0xff]   ;;  %vm371_vm1 = vcmask 293888   ;;  %v733_v8 = vld [vmem:[%s297_s23 + $0x10] ss:$0 sps:$4 sm:$0x33]  }
  0x29   : > { %680 = vmatprep.subr.bf16.mxu0 %v731_v6  ;;  %v734_v9 = vld [vmem:[%s935_s1] sm:$0xff]   ;;  %vm378_vm2 = vcmask 1041408   ;;  %v777_v11 = vmov 0   ;;  %v460_v13 = vld [vmem:[%s937_s3 + $0x8] sm:$0xff]  ;;  %v434_v17 = vld [vmem:[%s936_s2 + $0x18] sm:$0xff]  ;;  %v778_v21 = vmov 0.0  }
  0x2a   : > { %681 = vmatpush3.bf16.msra.mxu0 %v731_v6  ;;  %686 = vmatprep.mubr.msk.bf16.mxu0 %vm371_vm1, %v734_v9  ;;  %v459_v10 = vld [vmem:[%s937_s3] sm:$0xff]  ;;  %v432_v14 = vld [vmem:[%s936_s2 + $0x8] sm:$0xff]  ;;  %v380_v15 = vsel %vm378_vm2, %v733_v8, 0  ;;  %v433_v18 = vld [vmem:[%s936_s2 + $0x10] sm:$0xff]  ;;  %vm779_vm3 = vmmov 0   ;;  %vm526_vm4 = vcmask 261120  }
  0x2b   : > { %682 = vmatprep.subr.bf16.mxu0 %v732_v7  ;;  %730 = vset.pattern.permute.xlu1 %v777_v11  ;;  %v431_v12 = vld [vmem:[%s936_s2] sm:$0xff]  ;;  %v735_v16 = vld [vmem:[%s935_s1 + $0x8] sm:$0xff]   ;;  %v462_v19 = vld [vmem:[%s937_s3 + $0x18] sm:$0xff]  ;;  %vm574_vm5 = vcmask 7168  }
  0x2c   : > { %729 = vset.pattern.permute.xlu0 %v777_v11  ;;  %465 = vperm.xlu1 %730, %v459_v10   ;;  %v461_v20 = vld [vmem:[%s937_s3 + $0x10] sm:$0xff] }
  0x2d   : > { %437 = vperm.xlu0 %729, %v431_v12   ;;  %690 = vmatprep.subr.bf16.mxu1 %v778_v21 }
  0x2e   : > { %683 = vmatpush3.bf16.msra.mxu0 %v732_v7  ;;  %694 = vmatprep.mubr.msk.bf16.mxu1 %vm779_vm3, %v778_v21 }
  0x2f   : > { %698 = vmatprep.subr.msk.bf16.mxu0 %vm378_vm2, %v733_v8 }
  0x30   : > { %470 = vperm.xlu1 %730, %v460_v13  }
  0x31   : > { %442 = vperm.xlu0 %729, %v432_v14  }
  0x32   : > { %685 = vmatpush3.bf16.msra.mxu0 %v380_v15 }
  0x34   : > { %452 = vperm.xlu1 %730, %v434_v17  }
  0x35   : > { %687 = vmatmul.mubr.msk.bf16.vlgmr.msra.gmra.mrb[0].mxu0 %vm371_vm1, %v735_v16  ;;  %447 = vperm.xlu0 %729, %v433_v18   ;;  %v523_v16 = vld [vmem:[%s938_s4] sm:$0xf] }
  0x38   : > { %480 = vperm.xlu1 %730, %v462_v19  }
  0x39   : > { %475 = vperm.xlu0 %729, %v461_v20  }
  0xab   : > { %v466_v23 = vpop.permute.xlu1 %465 }
  0xac   : > { %v438_v22 = vpop.permute.xlu0 %437 }
  0xaf   : > { %v471_v25 = vpop.permute.xlu1 %470 }
  0xb0   : > { %v443_v24 = vpop.permute.xlu0 %442 }
  0xb3   : > { %v453_v27 = vpop.permute.xlu1 %452 }
  0xb4   : > { %v448_v26 = vpop.permute.xlu0 %447 }
  0xb7   : > { %v481_v37 = vpop.permute.xlu1 %480 }
  0xb8   : > { %v476_v31 = vpop.permute.xlu0 %475 }
 0x108   : > { %v688_v28 = vpop.f32.mrb[0].mxu0 }
 0x109   : > { %v457_v29 = vmul.f32 %v688_v28, %v448_v26  ;;  %v416_v30 = vpop.f32.mrb[1].mxu0 }
 0x10a   : > { %v455_v32 = vmul.f32 %v438_v22, %v416_v30  ;;  %v689_v33 = vpop.f32.mrb[2].mxu0 }
 0x10b   : > { %v485_v34 = vadd.f32 %v476_v31, %v457_v29  ;;  %v458_v35 = vmul.f32 %v689_v33, %v453_v27  ;;  %v419_v36 = vpop.f32.mrb[3].mxu0 }
 0x10c   : > { %v483_v38 = vadd.f32 %v466_v23, %v455_v32  ;;  %v456_v39 = vmul.f32 %v443_v24, %v419_v36  ;;  %v570_v23 = vld [vmem:[%s940_s6] sm:$0xff] }
 0x10d   : > { %v489_v40 = vmin.f32 %v485_v34, 20.0  ;;  %v486_v41 = vadd.f32 %v481_v37, %v458_v35  ;;  %v576_v24 = vld [vmem:[%s941_s7] sm:$0xff] }
 0x10e   : > { %v487_v42 = vmin.f32 %v483_v38, 20.0  ;;  %v484_v43 = vadd.f32 %v471_v25, %v456_v39 }
 0x10f   : > { %v495_v44 = vmul.f32 1.442695, %v489_v40  ;;  %v490_v45 = vmin.f32 %v486_v41, 20.0 }
 0x110   : > { %v491_v46 = vmul.f32 1.442695, %v487_v42  ;;  %v488_v47 = vmin.f32 %v484_v43, 20.0 }
 0x111   : > { %736 = vpow2.f32 %v495_v44  ;;  %v497_v48 = vmul.f32 1.442695, %v490_v45 }
 0x112   : > { %738 = vpow2.f32 %v491_v46  ;;  %v493_v49 = vmul.f32 1.442695, %v488_v47 }
 0x113   : > { %740 = vpow2.f32 %v497_v48 }
 0x114   : > { %742 = vpow2.f32 %v493_v49 }
 0x11b   : > { %v737_v50 = vpop.eup %736 }
 0x11c   : > { %v739_v51 = vpop.eup %738  ;;  %v501_v52 = vadd.f32 2.0, %v737_v50 }
 0x11d   : > { %v741_v53 = vpop.eup %740  ;;  %v499_v54 = vadd.f32 2.0, %v739_v51 }
 0x11e   : > { %v743_v55 = vpop.eup %742  ;;  %v505_v56 = vmul.f32 %v737_v50, %v501_v52  ;;  %v502_v57 = vadd.f32 2.0, %v741_v53 }
 0x11f   : > { %v500_v58 = vadd.f32 2.0, %v743_v55  ;;  %v503_v59 = vmul.f32 %v739_v51, %v499_v54 }
 0x120   : > { %v509_v60 = vadd.f32 2.0, %v505_v56  ;;  %v506_v61 = vmul.f32 %v741_v53, %v502_v57 }
 0x121   : > { %v504_v62 = vmul.f32 %v743_v55, %v500_v58  ;;  %v507_v63 = vadd.f32 2.0, %v503_v59 }
 0x122   : > { %744 = vrcp.f32 %v509_v60  ;;  %v510_v0 = vadd.f32 2.0, %v506_v61 }
 0x123   : > { %v508_v1 = vadd.f32 2.0, %v504_v62  ;;  %746 = vrcp.f32 %v507_v63 }
 0x124   : > { %748 = vrcp.f32 %v510_v0 }
 0x125   : > { %750 = vrcp.f32 %v508_v1 }
 0x12c   : > { %v745_v2 = vpop.eup %744 }
 0x12d   : > { %v747_v3 = vpop.eup %746  ;;  %v517_v4 = vmul.f32 %v745_v2, %v505_v56 }
 0x12e   : > { %v749_v5 = vpop.eup %748  ;;  %v515_v6 = vmul.f32 %v747_v3, %v503_v59 }
 0x12f   : > { %v751_v7 = vpop.eup %750  ;;  %v518_v8 = vmul.f32 %v749_v5, %v506_v61  ;;  %v521_v10 = vmul.f32 %v517_v4, %v485_v34 }
 0x130   : > { %v516_v9 = vmul.f32 %v751_v7, %v504_v62  ;;  %v519_v12 = vmul.f32 %v515_v6, %v483_v38 }
 0x131   : > { %v522_v11 = vmul.f32 %v518_v8, %v486_v41 }
 0x132   : > { %v520_v13 = vmul.f32 %v516_v9, %v484_v43 }
 0x133   : > { %v525_v14 = vpack.c.bf16 %v522_v11, %v521_v10 }
 0x134   : > { %v524_v15 = vpack.c.bf16 %v520_v13, %v519_v12 }
 0x136   : > { %691 = vmatpush3.bf16.msra.mxu1 %v524_v15 }
 0x137   : > { %692 = vmatprep.subr.bf16.mxu1 %v778_v21 }
 0x13a   : > { %693 = vmatpush3.bf16.msra.mxu1 %v525_v14 }
 0x13d   : > { %695 = vmatmul.mubr.msk.bf16.vlgmr.msra.gmra.mrb[0].mxu1 %vm526_vm4, %v523_v16 }
 0x210   : > { %v564_v17 = vpop.f32.mrb[0].mxu1 }
 0x211   : > { %582 = vst [vmem:[%s864_s22] sm:$0xff] %v564_v17  ;;  %571 = vadd.xlane.f32.xlu0 %v564_v17  ;;  %v696_v18 = vpop.f32.mrb[1].mxu1  ;;  %v577_v19 = vmul.f32 %v564_v17, %v564_v17 }
 0x212   : > { %v567_v20 = vpop.f32.mrb[2].mxu1 }
 0x213   : > { %578 = vadd.xlane.f32.xlu1 %v577_v19  ;;  %v697_v22 = vpop.f32.mrb[3].mxu1 }
 0x29e   : > { %v572_v21 = vpop.xlane.xlu0 %571 }
 0x29f   : > { %v573_v25 = vadd.f32 %v572_v21, %v570_v23 }
 0x2a0   : > { %v579_v26 = vpop.xlane.xlu1 %578 }
 0x2a1   : > { %575 = vst.msk [vmem:[%s940_s6] sm:$0xff] %vm574_vm5, %v573_v25  ;;  %v580_v27 = vadd.f32 %v579_v26, %v576_v24 }
 0x2a3   : > { %581 = vst.msk [vmem:[%s941_s7] sm:$0xff] %vm574_vm5, %v580_v27 }
 0x2a4 PF: > { %p15_p10 = scmp.ge.s32.totalorder %s839_s28, 6   ;;  %s942_s24 = smov %s770_s25 }
 0x2a5   : > { %s943_s25 = smov %s848_s8  ;;  %s944_s26 = smov %s839_s28 }
 0x2a6   :  { %17 = sbr.rel (!%p15_p10) target bundleno = 2 (0x2), region = 136 }

</bundles_post_ra>
